<compile_context>
chip_gen: v7x
topology: tpu7x:2x2x1
jax: 0.10.0
libtpu: 0.0.40
codegen_flags: <defaults>
</compile_context>

<pallas_src>
import functools
import math

import jax
import jax.numpy as jnp
from jax.experimental import pallas as pl
from jax.experimental.pallas import tpu as pltpu


def _fused_kernel(x_ref, w_ref, gb_ref, out_ref, stats_ref, coef_ref,
                  *, m_total, groups, c_out, eps):
    phase = pl.program_id(0)
    i = pl.program_id(1)

    @pl.when((phase == 0) & (i == 0))
    def _():
        stats_ref[...] = jnp.zeros_like(stats_ref)

    # 1x1 conv == matmul over the (grouped) channel axis.  Recomputed in both
    # phases; the kernel is HBM-bound so the extra MXU work is free.
    y = jnp.dot(x_ref[...], w_ref[...], preferred_element_type=jnp.float32)

    @pl.when(phase == 0)
    def _():
        # Padded rows are exactly zero (no bias), so they contribute nothing.
        s1 = jnp.sum(y, axis=0, keepdims=True)
        s2 = jnp.sum(y * y, axis=0, keepdims=True)
        stats_ref[...] += jnp.concatenate([s1, s2], axis=0)

    @pl.when((phase == 1) & (i == 0))
    def _():
        # Fold the per-lane-group partial sums into full per-channel sums:
        # summing all lane rotations by multiples of c_out leaves, in every
        # lane, the total for that lane's channel (lane % c_out), already
        # replicated across the groups -- exactly the tiled layout needed
        # for the per-lane scale/shift below.
        s = stats_ref[...]
        folded = s
        for g in range(1, groups):
            folded = folded + pltpu.roll(s, shift=g * c_out, axis=1)
        inv_m = 1.0 / float(m_total)
        mean = folded[0:1, :] * inv_m
        var = folded[1:2, :] * inv_m - mean * mean
        inv_std = jax.lax.rsqrt(var + eps)
        scale = gb_ref[0:1, :] * inv_std            # gamma / sqrt(var + eps)
        shift = gb_ref[1:2, :] - mean * scale       # beta - mean * scale
        coef_ref[...] = jnp.concatenate([scale, shift], axis=0)

    @pl.when(phase == 1)
    def _():
        out_ref[...] = jnp.maximum(
            y * coef_ref[0:1, :] + coef_ref[1:2, :], 0.0)


def conv2d_forward(x, weight, bias, gamma, beta, *, eps=1e-5, tm=1024):
    """Forward of GMAN's conv2d_ (1x1 conv + train-mode BatchNorm2d + ReLU).

    x: (B, T, N, C_in) float32; weight: (C_in, C_out); bias/gamma/beta: (C_out,).
    `bias` is accepted for parity with the module but is mathematically a
    no-op under training-mode batch norm, so the kernel never reads it.
    """
    del bias  # cancels exactly against the batch mean
    B, T, N, Cin = x.shape
    Cout = weight.shape[1]
    M = B * T * N

    # Fold G consecutive rows into the lane axis when C_out < 128 divides 128,
    # so compute and stores are lane-dense (128 live lanes).
    G = 128 // Cout if (Cout < 128 and 128 % Cout == 0) else 1
    Cin_g, Cout_g = G * Cin, G * Cout

    # Row tiling of the grouped (M/G, G*C_in) view; shrink for tiny problems.
    Mg_needed = -(-M // G)
    tm = max(8, min(tm, -(-Mg_needed // 8) * 8))
    Mg = -(-Mg_needed // tm) * tm          # grouped rows, padded
    Mp = Mg * G                            # original rows, padded
    nt = Mg // tm

    xf = x.reshape(M, Cin).astype(jnp.float32)
    if Mp != M:
        xf = jnp.pad(xf, ((0, Mp - M), (0, 0)))
    xg = xf.reshape(Mg, Cin_g)

    w = weight.astype(jnp.float32)
    if G > 1:
        # Block-diagonal weight: (M/G, G*C_in) @ Wg == row-grouped view of x @ W.
        wg = jnp.einsum("gh,cd->gchd", jnp.eye(G, dtype=jnp.float32), w)
        wg = wg.reshape(Cin_g, Cout_g)
    else:
        wg = w
    gb = jnp.stack([jnp.tile(gamma.astype(jnp.float32), G),
                    jnp.tile(beta.astype(jnp.float32), G)])   # (2, Cout_g)

    kernel = functools.partial(
        _fused_kernel, m_total=M, groups=G, c_out=Cout, eps=float(eps))

    out_g = pl.pallas_call(
        kernel,
        out_shape=jax.ShapeDtypeStruct((Mg, Cout_g), jnp.float32),
        grid_spec=pltpu.PrefetchScalarGridSpec(
            num_scalar_prefetch=0,
            grid=(2, nt),                       # (phase, row tile)
            in_specs=[
                pl.BlockSpec((tm, Cin_g), lambda p, i: (i, 0)),
                pl.BlockSpec((Cin_g, Cout_g), lambda p, i: (0, 0)),
                pl.BlockSpec((2, Cout_g), lambda p, i: (0, 0)),
            ],
            # Freeze the output block index at 0 during the stats phase so no
            # garbage blocks are ever written back to HBM; phase 1 walks the
            # row tiles normally.
            out_specs=pl.BlockSpec((tm, Cout_g), lambda p, i: (i * p, 0)),
            scratch_shapes=[
                pltpu.VMEM((2, Cout_g), jnp.float32),   # [sum; sum_sq]
                pltpu.VMEM((2, Cout_g), jnp.float32),   # [scale; shift]
            ],
        ),
        compiler_params=pltpu.CompilerParams(
            dimension_semantics=("arbitrary", "arbitrary")),
    )(xg, wg, gb)

    return out_g.reshape(Mp, Cout)[:M].reshape(B, T, N, Cout)


def _reference(x, weight, bias, gamma, beta, eps=1e-5):
    """Pure-JAX reference of the PyTorch forward (1x1 conv, train-mode BN, ReLU)."""
    y = jnp.einsum("btnc,cd->btnd", x, weight) + bias
    mean = jnp.mean(y, axis=(0, 1, 2))
    var = jnp.mean((y - mean) ** 2, axis=(0, 1, 2))
    yn = (y - mean) / jnp.sqrt(var + eps) * gamma + beta
    return jnp.maximum(yn, 0.0)


if __name__ == "__main__":
    B, T, N = 2, 8, 16            # batch, num_step, num_vertex
    C_in, C_out = 4, 32           # input_dims, output_dims

    key = jax.random.PRNGKey(0)
    kx, kw = jax.random.split(key)

    x = jax.random.normal(kx, (B, T, N, C_in), dtype=jnp.float32)

    # Parameters, initialized exactly as the module's __init__ does:
    #  - conv weight: xavier_uniform_ on a (C_out, C_in, 1, 1) kernel
    #  - conv bias:   zeros
    #  - batch norm:  gamma = 1, beta = 0, eps = 1e-5 (momentum only affects
    #    running stats, which do not influence training-mode output)
    bound = math.sqrt(6.0 / (C_in + C_out))
    weight = jax.random.uniform(
        kw, (C_in, C_out), dtype=jnp.float32, minval=-bound, maxval=bound
    )
    bias = jnp.zeros((C_out,), dtype=jnp.float32)
    gamma = jnp.ones((C_out,), dtype=jnp.float32)
    beta = jnp.zeros((C_out,), dtype=jnp.float32)

    out = conv2d_forward(x, weight, bias, gamma, beta)
    out = jax.block_until_ready(out)

    ref = _reference(x, weight, bias, gamma, beta)
    assert out.shape == (B, T, N, C_out), out.shape
    assert jnp.allclose(out, ref, atol=1e-4, rtol=1e-4), "mismatch vs reference"

    print("KERNEL_OK")
</pallas_src>

<mosaic_0001>
module attributes {stable_mosaic.version = 11 : i64} {
  func.func @_fused_kernel(%arg0: i32, %arg1: i32, %arg2: memref<64x16xf32, #tpu.memory_space<vmem>>, %arg3: memref<16x128xf32, #tpu.memory_space<vmem>>, %arg4: memref<2x128xf32, #tpu.memory_space<vmem>>, %arg5: memref<64x128xf32, #tpu.memory_space<vmem>>, %arg6: memref<2x128xf32, #tpu.memory_space<vmem>>, %arg7: memref<2x128xf32, #tpu.memory_space<vmem>>) attributes {dimension_semantics = [#tpu.dimension_semantics<arbitrary>, #tpu.dimension_semantics<arbitrary>], iteration_bounds = array<i64: 2, 1>, scalar_prefetch = 0 : i64, scratch_operands = 2 : i64, tpu.core_type = #tpu.core_type<tc>, window_params = [{transform_indices = @transform_0, window_bounds = array<i64: 64, 16>}, {pipeline_mode = #tpu.pipeline_mode<synchronous>, transform_indices = @transform_1, window_bounds = array<i64: 16, 128>}, {pipeline_mode = #tpu.pipeline_mode<synchronous>, transform_indices = @transform_2, window_bounds = array<i64: 2, 128>}, {transform_indices = @transform_3, window_bounds = array<i64: 64, 128>}]} {
    %c0_i32 = arith.constant 0 : i32
    %0 = arith.cmpi eq, %arg0, %c0_i32 : i32
    %c0_i32_0 = arith.constant 0 : i32
    %1 = arith.cmpi eq, %arg1, %c0_i32_0 : i32
    %2 = arith.andi %0, %1 : i1
    %3 = arith.extui %2 : i1 to i32
    %c0_i32_1 = arith.constant 0 : i32
    %4 = arith.cmpi ne, %3, %c0_i32_1 : i32
    scf.if %4 {
      %cst_11 = arith.constant 0.000000e+00 : f32
      %19 = vector.broadcast %cst_11 : f32 to vector<2x128xf32>
      %c0_12 = arith.constant 0 : index
      %c0_13 = arith.constant 0 : index
      %20 = vector.load %arg6[%c0_12, %c0_13] : memref<2x128xf32, #tpu.memory_space<vmem>>, vector<2x128xf32>
      tpu.vector_store %arg6[%c0_12, %c0_13], %19 {strides = array<i32>} : memref<2x128xf32, #tpu.memory_space<vmem>>, vector<2x128xf32>,
    } else {
    }
    %c0 = arith.constant 0 : index
    %c0_2 = arith.constant 0 : index
    %5 = vector.load %arg2[%c0, %c0_2] : memref<64x16xf32, #tpu.memory_space<vmem>>, vector<64x16xf32>
    %c0_3 = arith.constant 0 : index
    %c0_4 = arith.constant 0 : index
    %6 = vector.load %arg3[%c0_3, %c0_4] : memref<16x128xf32, #tpu.memory_space<vmem>>, vector<16x128xf32>
    %cst = arith.constant dense<0.000000e+00> : vector<64x128xf32>
    %7 = tpu.matmul %5, %6, %cst {dimension_numbers = #tpu.dot_dimension_numbers<[1], [0], [0], [1], [0, 0, 1, 1], [], []>} : vector<64x16xf32>, vector<16x128xf32>, vector<64x128xf32> -> vector<64x128xf32>
    %c0_i32_5 = arith.constant 0 : i32
    %8 = arith.cmpi eq, %arg0, %c0_i32_5 : i32
    %9 = arith.extui %8 : i1 to i32
    %c0_i32_6 = arith.constant 0 : i32
    %10 = arith.cmpi ne, %9, %c0_i32_6 : i32
    scf.if %10 {
      %cst_11 = arith.constant dense<0.000000e+00> : vector<128xf32>
      %19 = vector.multi_reduction <add>, %7, %cst_11 [0] : vector<64x128xf32> to vector<128xf32>
      %20 = vector.shape_cast %19 : vector<128xf32> to vector<1x128xf32>
      %21 = arith.mulf %7, %7 : vector<64x128xf32>
      %cst_12 = arith.constant dense<0.000000e+00> : vector<128xf32>
      %22 = vector.multi_reduction <add>, %21, %cst_12 [0] : vector<64x128xf32> to vector<128xf32>
      %23 = vector.shape_cast %22 : vector<128xf32> to vector<1x128xf32>
      %c0_13 = arith.constant 0 : index
      %c0_14 = arith.constant 0 : index
      %24 = vector.load %arg6[%c0_13, %c0_14] : memref<2x128xf32, #tpu.memory_space<vmem>>, vector<2x128xf32>
      %25 = tpu.concatenate %20, %23 in 0 : vector<1x128xf32>, vector<1x128xf32> -> vector<2x128xf32>
      %26 = arith.addf %24, %25 : vector<2x128xf32>
      %c0_15 = arith.constant 0 : index
      %c0_16 = arith.constant 0 : index
      %27 = vector.load %arg6[%c0_15, %c0_16] : memref<2x128xf32, #tpu.memory_space<vmem>>, vector<2x128xf32>
      tpu.vector_store %arg6[%c0_15, %c0_16], %26 {strides = array<i32>} : memref<2x128xf32, #tpu.memory_space<vmem>>, vector<2x128xf32>,
    } else {
    }
    %c1_i32 = arith.constant 1 : i32
    %11 = arith.cmpi eq, %arg0, %c1_i32 : i32
    %c0_i32_7 = arith.constant 0 : i32
    %12 = arith.cmpi eq, %arg1, %c0_i32_7 : i32
    %13 = arith.andi %11, %12 : i1
    %14 = arith.extui %13 : i1 to i32
    %c0_i32_8 = arith.constant 0 : i32
    %15 = arith.cmpi ne, %14, %c0_i32_8 : i32
    scf.if %15 {
      %c0_11 = arith.constant 0 : index
      %c0_12 = arith.constant 0 : index
      %19 = vector.load %arg6[%c0_11, %c0_12] : memref<2x128xf32, #tpu.memory_space<vmem>>, vector<2x128xf32>
      %c32_i32 = arith.constant 32 : i32
      %20 = tpu.dynamic_rotate %19 by %c32_i32 dim 1 : vector<2x128xf32>, i32 -> vector<2x128xf32>
      %21 = arith.addf %19, %20 : vector<2x128xf32>
      %c64_i32 = arith.constant 64 : i32
      %22 = tpu.dynamic_rotate %19 by %c64_i32 dim 1 : vector<2x128xf32>, i32 -> vector<2x128xf32>
      %23 = arith.addf %21, %22 : vector<2x128xf32>
      %c96_i32 = arith.constant 96 : i32
      %24 = tpu.dynamic_rotate %19 by %c96_i32 dim 1 : vector<2x128xf32>, i32 -> vector<2x128xf32>
      %25 = arith.addf %23, %24 : vector<2x128xf32>
      %26 = vector.extract_strided_slice %25 {offsets = [0, 0], sizes = [1, 128], strides = [1, 1]} : vector<2x128xf32> to vector<1x128xf32>
      %cst_13 = arith.constant 3.906250e-03 : f32
      %27 = vector.broadcast %cst_13 : f32 to vector<1x128xf32>
      %28 = arith.mulf %26, %27 : vector<1x128xf32>
      %29 = vector.extract_strided_slice %25 {offsets = [1, 0], sizes = [1, 128], strides = [1, 1]} : vector<2x128xf32> to vector<1x128xf32>
      %cst_14 = arith.constant 3.906250e-03 : f32
      %30 = vector.broadcast %cst_14 : f32 to vector<1x128xf32>
      %31 = arith.mulf %29, %30 : vector<1x128xf32>
      %32 = arith.mulf %28, %28 : vector<1x128xf32>
      %33 = arith.subf %31, %32 : vector<1x128xf32>
      %cst_15 = arith.constant 9.99999974E-6 : f32
      %34 = vector.broadcast %cst_15 : f32 to vector<1x128xf32>
      %35 = arith.addf %33, %34 : vector<1x128xf32>
      %36 = math.rsqrt %35 : vector<1x128xf32>
      %c0_16 = arith.constant 0 : index
      %c0_17 = arith.constant 0 : index
      %37 = vector.load %arg4[%c0_16, %c0_17] : memref<2x128xf32, #tpu.memory_space<vmem>>, vector<1x128xf32>
      %38 = arith.mulf %37, %36 : vector<1x128xf32>
      %c1 = arith.constant 1 : index
      %c0_18 = arith.constant 0 : index
      %39 = vector.load %arg4[%c1, %c0_18] : memref<2x128xf32, #tpu.memory_space<vmem>>, vector<1x128xf32>
      %40 = arith.mulf %28, %38 : vector<1x128xf32>
      %41 = arith.subf %39, %40 : vector<1x128xf32>
      %42 = tpu.concatenate %38, %41 in 0 : vector<1x128xf32>, vector<1x128xf32> -> vector<2x128xf32>
      %c0_19 = arith.constant 0 : index
      %c0_20 = arith.constant 0 : index
      %43 = vector.load %arg7[%c0_19, %c0_20] : memref<2x128xf32, #tpu.memory_space<vmem>>, vector<2x128xf32>
      tpu.vector_store %arg7[%c0_19, %c0_20], %42 {strides = array<i32>} : memref<2x128xf32, #tpu.memory_space<vmem>>, vector<2x128xf32>,
    } else {
    }
    %c1_i32_9 = arith.constant 1 : i32
    %16 = arith.cmpi eq, %arg0, %c1_i32_9 : i32
    %17 = arith.extui %16 : i1 to i32
    %c0_i32_10 = arith.constant 0 : i32
    %18 = arith.cmpi ne, %17, %c0_i32_10 : i32
    scf.if %18 {
      %c0_11 = arith.constant 0 : index
      %c0_12 = arith.constant 0 : index
      %19 = vector.load %arg7[%c0_11, %c0_12] : memref<2x128xf32, #tpu.memory_space<vmem>>, vector<1x128xf32>
      %20 = vector.broadcast %19 : vector<1x128xf32> to vector<64x128xf32>
      %21 = arith.mulf %7, %20 : vector<64x128xf32>
      %c1 = arith.constant 1 : index
      %c0_13 = arith.constant 0 : index
      %22 = vector.load %arg7[%c1, %c0_13] : memref<2x128xf32, #tpu.memory_space<vmem>>, vector<1x128xf32>
      %23 = vector.broadcast %22 : vector<1x128xf32> to vector<64x128xf32>
      %24 = arith.addf %21, %23 : vector<64x128xf32>
      %cst_14 = arith.constant 0.000000e+00 : f32
      %25 = vector.broadcast %cst_14 : f32 to vector<64x128xf32>
      %26 = arith.maximumf %24, %25 : vector<64x128xf32>
      %c0_15 = arith.constant 0 : index
      %c0_16 = arith.constant 0 : index
      %27 = vector.load %arg5[%c0_15, %c0_16] : memref<64x128xf32, #tpu.memory_space<vmem>>, vector<64x128xf32>
      tpu.vector_store %arg5[%c0_15, %c0_16], %26 {strides = array<i32>} : memref<64x128xf32, #tpu.memory_space<vmem>>, vector<64x128xf32>,
    } else {
    }
    return
  }
  func.func @transform_0(%arg0: i32, %arg1: i32) -> (i32, i32) {
    %c0_i32 = arith.constant 0 : i32
    %c0_i32_0 = arith.constant 0 : i32
    return %arg1, %c0_i32 : i32, i32
  }
  func.func @transform_1(%arg0: i32, %arg1: i32) -> (i32, i32) {
    %c0_i32 = arith.constant 0 : i32
    %c0_i32_0 = arith.constant 0 : i32
    %c0_i32_1 = arith.constant 0 : i32
    return %c0_i32, %c0_i32_0 : i32, i32
  }
  func.func @transform_2(%arg0: i32, %arg1: i32) -> (i32, i32) {
    %c0_i32 = arith.constant 0 : i32
    %c0_i32_0 = arith.constant 0 : i32
    %c0_i32_1 = arith.constant 0 : i32
    return %c0_i32, %c0_i32_0 : i32, i32
  }
  func.func @transform_3(%arg0: i32, %arg1: i32) -> (i32, i32) {
    %0 = arith.muli %arg1, %arg0 : i32
    %c0_i32 = arith.constant 0 : i32
    %c0_i32_0 = arith.constant 0 : i32
    return %0, %c0_i32 : i32, i32
  }
}

</mosaic_0001>

<bundles_post_ra>
// kernel: tpu_custom_call.1
= control target key start
LH: loop header
LB: loop body
LE: loop exit
PB: predicated region body
PF: predicated region fallthrough
CT: control target
= control target key end

     0   :  { %8 = vsyncpa [#allocation5], 0  ;;  %s882_s0 = inlined_call_operand.vmem [shape: f32[64,16], index: 0, kind: input, shape index: {}]   ;;  %s883_s1 = inlined_call_operand.vmem [shape: f32[16,128], index: 1, kind: input, shape index: {}]   ;;  %s884_s2 = inlined_call_operand.vmem [shape: f32[2,128], index: 2, kind: input, shape index: {}]   ;;  %s885_s3 = inlined_call_operand.hbm [shape: f32[64,128], index: 3, kind: output, shape index: {}]  }
   0x1   :  { %10 = vsyncpa [#allocation5 + $0x1], 0  ;;  %s728_s12 = smov 0   ;;  %s730_s13 = smov 0  }
   0x2   :  { %s732_s14 = smov 0  }
   0x3 LB: > { %s546_s15 = sadd.s32 4294967295, %s699_s14   ;;  %s547_s16 = sadd.s32 4294967294, %s699_s14   ;;  %s699_s14 = sphi %s732_s14, %s16_s14   ;;  %s695_s13 = sphi %s730_s13, %s888_s13   ;;  %s691_s12 = sphi %s728_s12, %s887_s12  }
   0x4   : > { %s28_s17 = sadd.s32 1, %s695_s13  ;;  %p550_p0 = scmp.ge.s32.totalorder %s699_s14, 1 }
   0x5   : > { %p30_p1 = scmp.ge.s32.totalorder %s28_s17, 2  ;;  %p155_p2 = scmp.lt.s32.totalorder %s699_s14, 3 }
   0x7   : > { %s890_s17 = smov (%p30_p1, %s28_s17), 0  ;;  %p156_p3 = pnand %p550_p0, %p155_p2 }
   0x8   : > { %p187_p4 = scmp.eq.s32.totalorder (!%p156_p3), %s691_s12, 0 }
   0x9   : > { %159 = sbr.rel (%p156_p3) target bundleno = 481 (0x1e1), region = 32 }
  0x10   : > { %192 = sbr.rel (!%p187_p4) target bundleno = 23 (0x17), region = 36  ;;  %v701_v0 = vmov (%p187_p4), 0.0  }
  0x11   : > { %193 = vst [vmem:[#allocation2] sm:$0x3] (%p187_p4), %v701_v0 }
  0x17 PF: > { %v202_v1 = vld [vmem:[%s883_s1] sm:$0xff]  ;;  %v203_v2 = vld [vmem:[%s883_s1 + $0x8] sm:$0xff]  ;;  %vm204_vm0 = vcmask 130048   ;;  %v196_v8 = vld [vmem:[%s882_s0 + $0x10] sm:$0xff]  ;;  %p560_p5 = scmp.ne.s32.totalorder %s691_s12, 0 }
  0x18   : > { %v194_v3 = vld [vmem:[%s882_s0] sm:$0xff]  ;;  %v597_v4 = vpack.c.bf16 %v203_v2, %v202_v1  ;;  %v195_v6 = vld [vmem:[%s882_s0 + $0x8] sm:$0xff]  ;;  %v200_v9 = vld [vmem:[%s882_s0 + $0x30] sm:$0xff]  ;;  %vm372_vm1 = vcmask (!%p560_p5), 1040384  }
  0x19   : > { %585 = vmatprep.mubr.msk.f32.mxu0 %vm204_vm0, %v194_v3  ;;  %v198_v5 = vld [vmem:[%s882_s0 + $0x20] sm:$0xff]  ;;  %v199_v7 = vld [vmem:[%s882_s0 + $0x28] sm:$0xff]  ;;  %v197_v10 = vld [vmem:[%s882_s0 + $0x18] sm:$0xff] }
  0x1a   : > { %591 = vmatprep.mubr.msk.f32.mxu1 %vm204_vm0, %v198_v5  ;;  %598 = vmatprep.subr.bf16.mxu0 %v597_v4  ;;  %v201_v11 = vld [vmem:[%s882_s0 + $0x38] sm:$0xff]  ;;  %v371_v54 = vld [vmem:[#allocation2] sm:$0x3] (!%p560_p5) }
  0x1b   : > { %601 = vmatprep.subr.bf16.mxu1 %v597_v4  ;;  %600 = vmatpush3.bf16.msra.mxu0 %v597_v4 }
  0x1c   : > { %602 = vmatpush3.bf16.msra.mxu1 %v597_v4 }
  0x1e   : > { %586 = vmatmul.mubr.msk.f32.vlgmr.msra.gmra.mrb[0].mxu0 %vm204_vm0, %v195_v6 }
  0x1f   : > { %592 = vmatmul.mubr.msk.f32.vlgmr.msra.gmra.mrb[0].mxu1 %vm204_vm0, %v199_v7  ;;  %588 = vmatprep.mubr.msk.f32.mxu0 %vm204_vm0, %v196_v8 }
  0x20   : > { %594 = vmatprep.mubr.msk.f32.mxu1 %vm204_vm0, %v200_v9 }
  0x22   : > { %589 = vmatmul.mubr.msk.f32.gmra.mrb[2].mxu0 %vm204_vm0, %v197_v10 }
  0x23   : > { %595 = vmatmul.mubr.msk.f32.gmra.mrb[2].mxu1 %vm204_vm0, %v201_v11 }
  0xf1   : > { %v789_v12 = vpop.f32.mrb[0].mxu0  ;;  %336 = sbr.rel (%p560_p5) target bundleno = 277 (0x115), region = 40 }
  0xf2   : > { %v791_v13 = vpop.f32.mrb[0].mxu1  ;;  %v793_v14 = vpop.f32.mrb[1].mxu0  ;;  %v351_v22 = vmul.f32 (!%p560_p5), %v789_v12, %v789_v12 }
  0xf3   : > { %v795_v15 = vpop.f32.mrb[1].mxu1  ;;  %v337_v20 = vadd.f32 (!%p560_p5), %v789_v12, %v793_v14  ;;  %v350_v21 = vmul.f32 (!%p560_p5), %v793_v14, %v793_v14  ;;  %v355_v31 = vmul.f32 (!%p560_p5), %v791_v13, %v791_v13 }
  0xf4   : > { %v354_v28 = vmul.f32 (!%p560_p5), %v795_v15, %v795_v15 }
  0xf5   : > { %v797_v16 = vpop.f32.mrb[2].mxu0  ;;  %v358_v26 = vadd.f32 (!%p560_p5), %v351_v22, %v350_v21 }
  0xf6   : > { %v799_v17 = vpop.f32.mrb[2].mxu1  ;;  %v801_v18 = vpop.f32.mrb[3].mxu0  ;;  %v353_v25 = vmul.f32 (!%p560_p5), %v797_v16, %v797_v16 }
  0xf7   : > { %v803_v19 = vpop.f32.mrb[3].mxu1  ;;  %v352_v23 = vmul.f32 (!%p560_p5), %v801_v18, %v801_v18  ;;  %v338_v24 = vadd.f32 (!%p560_p5), %v337_v20, %v801_v18  ;;  %v357_v37 = vmul.f32 (!%p560_p5), %v799_v17, %v799_v17 }
  0xf8   : > { %v356_v34 = vmul.f32 %v803_v19, %v803_v19 }
  0xf9   : > { %v339_v27 = vadd.f32 %v797_v16, %v338_v24  ;;  %v359_v29 = vadd.f32 %v358_v26, %v352_v23 }
  0xfb   : > { %v340_v30 = vadd.f32 %v339_v27, %v795_v15  ;;  %v360_v32 = vadd.f32 %v359_v29, %v353_v25 }
  0xfd   : > { %v341_v33 = vadd.f32 %v791_v13, %v340_v30  ;;  %v361_v35 = vadd.f32 %v360_v32, %v354_v28 }
  0xff   : > { %v342_v36 = vadd.f32 %v341_v33, %v803_v19  ;;  %v362_v38 = vadd.f32 %v361_v35, %v355_v31 }
 0x101   : > { %v343_v39 = vadd.f32 %v799_v17, %v342_v36  ;;  %v363_v40 = vadd.f32 %v362_v38, %v356_v34 }
 0x103   : > { %v344_v41 = vrot.slane %v343_v39, 4  ;;  %v364_v42 = vadd.f32 %v363_v40, %v357_v37 }
 0x105   : > { %v345_v43 = vadd.f32 %v344_v41, %v343_v39  ;;  %v365_v44 = vrot.slane %v364_v42, 4 }
 0x107   : > { %v346_v45 = vrot.slane %v345_v43, 2  ;;  %v366_v46 = vadd.f32 %v365_v44, %v364_v42 }
 0x109   : > { %v347_v47 = vadd.f32 %v346_v45, %v345_v43  ;;  %v367_v48 = vrot.slane %v366_v46, 2 }
 0x10b   : > { %v348_v49 = vrot.slane %v347_v47, 1  ;;  %v368_v50 = vadd.f32 %v367_v48, %v366_v46 }
 0x10d   : > { %v349_v51 = vadd.f32 %v348_v49, %v347_v47  ;;  %v369_v52 = vrot.slane %v368_v50, 1 }
 0x10f   : > { %v370_v53 = vadd.f32 %v369_v52, %v368_v50 }
 0x111   : > { %v373_v55 = vsel %vm372_vm1, %v349_v51, %v370_v53 }
 0x112   : > { %v374_v56 = vadd.f32 %v373_v55, %v371_v54 }
 0x114   : > { %375 = vst [vmem:[#allocation2] sm:$0x3] %v374_v56 }
 0x115 PF: > { %p376_p6 = scmp.eq.s32.totalorder %s691_s12, 1 }
 0x116   : > { %s702_s11 = smov (%p376_p6), 32   ;;  %s703_s18 = smov (%p376_p6), 96   ;;  %v399_v6 = vld [vmem:[%s884_s2] sm:$0x1] (%p376_p6)  ;;  %v404_v9 = vld [vmem:[%s884_s2 + $0x1] sm:$0x1] (%p376_p6) }
 0x117   : > { %380 = sbr.rel (!%p376_p6) target bundleno = 440 (0x1b8), region = 44  ;;  %s704_s19 = smov (%p376_p6), 64   ;;  %vm410_vm2 = vcmask (%p376_p6), 1040384  }
 0x11b   : > { %v381_v57 = vld [vmem:[#allocation2] sm:$0x3] (%p376_p6) }
 0x11c   : > { %382 = vrot.lane.b32.xlu0 (%p376_p6), %v381_v57, %s702_s11  ;;  %388 = vrot.lane.b32.xlu1 (%p376_p6), %v381_v57, %s703_s18 }
 0x120   : > { %385 = vrot.lane.b32.xlu0 %v381_v57, %s704_s19 }
 0x18e   : > { %v383_v58 = vpop.permute.xlu0 %382  ;;  %v389_v61 = vpop.permute.xlu1 %388 }
 0x18f   : > { %v384_v59 = vadd.f32 %v383_v58, %v381_v57 }
 0x192   : > { %v386_v60 = vpop.permute.xlu0 %385 }
 0x193   : > { %v387_v62 = vadd.f32 %v386_v60, %v384_v59 }
 0x195   : > { %v390_v63 = vadd.f32 %v389_v61, %v387_v62 }
 0x197   : > { %v391_v0 = vmul.f32 0.00390625, %v390_v63 }
 0x199   : > { %v392_v1 = vmul.f32 %v391_v0, %v391_v0 }
 0x19b   : > { %v394_v2 = vrot.slane %v392_v1, 7 }
 0x19d   : > { %v396_v3 = vsub.f32 %v391_v0, %v394_v2 }
 0x19f   : > { %v397_v4 = vadd.f32 1e-05, %v396_v3 }
 0x1a1   : > { %645 = vrsqrt.f32 %v397_v4 }
 0x1ab   : > { %v646_v5 = vpop.eup %645 }
 0x1ac   : > { %v401_v7 = vrot.slane %v646_v5, 1 }
 0x1ae   : > { %v403_v8 = vmul.f32 %v401_v7, %v399_v6 }
 0x1b0   : > { %v405_v10 = vmul.f32 %v403_v8, %v391_v0 }
 0x1b2   : > { %v406_v11 = vsub.f32 %v404_v9, %v405_v10 }
 0x1b4   : > { %v408_v20 = vrot.slane %v406_v11, 7 }
 0x1b6   : > { %v411_v21 = vsel %vm410_vm2, %v403_v8, %v408_v20 }
 0x1b7   : > { %412 = vst [vmem:[#allocation3] sm:$0x3] %v411_v21 }
 0x1b8 PF: > { %p562_p7 = scmp.ne.s32.totalorder %s691_s12, 1 }
 0x1ba   : > { %415 = sbr.rel (%p562_p7) target bundleno = 457 (0x1c9), region = 48 }
 0x1be   : > { %v563_v22 = vld [vmem:[#allocation3] ss:$0 sm:$0xff] (!%p562_p7)  ;;  %v564_v23 = vld [vmem:[#allocation3 + $0x1] ss:$0 sm:$0xff] (!%p562_p7) }
 0x1bf   : > { %v421_v24 = vmul.f32 (!%p562_p7), %v563_v22, %v793_v14  ;;  %v422_v25 = vmul.f32 (!%p562_p7), %v789_v12, %v563_v22  ;;  %v423_v26 = vmul.f32 (!%p562_p7), %v563_v22, %v801_v18  ;;  %v424_v27 = vmul.f32 (!%p562_p7), %v797_v16, %v563_v22 }
 0x1c0   : > { %v425_v28 = vmul.f32 (!%p562_p7), %v563_v22, %v795_v15  ;;  %v426_v29 = vmul.f32 (!%p562_p7), %v791_v13, %v563_v22  ;;  %v427_v30 = vmul.f32 (!%p562_p7), %v563_v22, %v803_v19  ;;  %v428_v31 = vmul.f32 (!%p562_p7), %v799_v17, %v563_v22 }
 0x1c1   : > { %v434_v32 = vadd.f32 %v564_v23, %v421_v24  ;;  %v435_v33 = vadd.f32 %v564_v23, %v422_v25  ;;  %v436_v34 = vadd.f32 %v564_v23, %v423_v26  ;;  %v437_v35 = vadd.f32 %v564_v23, %v424_v27 }
 0x1c2   : > { %v438_v36 = vadd.f32 %v564_v23, %v425_v28  ;;  %v439_v14 = vadd.f32 %v564_v23, %v426_v29  ;;  %v440_v37 = vadd.f32 %v564_v23, %v427_v30  ;;  %v441_v12 = vadd.f32 %v564_v23, %v428_v31 }
 0x1c3   : > { %v442_v38 = vmax.f32 %v434_v32, 0.0  ;;  %v443_v18 = vmax.f32 %v435_v33, 0.0  ;;  %v444_v39 = vmax.f32 %v436_v34, 0.0  ;;  %v445_v16 = vmax.f32 %v437_v35, 0.0 }
 0x1c4   : > { %v446_v40 = vmax.f32 %v438_v36, 0.0  ;;  %v447_v15 = vmax.f32 %v439_v14, 0.0  ;;  %v448_v41 = vmax.f32 %v440_v37, 0.0  ;;  %v449_v13 = vmax.f32 %v441_v12, 0.0 }
 0x1c5   : > { %450 = vst [vmem:[#allocation4] sm:$0xff] %v442_v38  ;;  %451 = vst [vmem:[#allocation4 + $0x8] sm:$0xff] %v443_v18 }
 0x1c6   : > { %452 = vst [vmem:[#allocation4 + $0x10] sm:$0xff] %v444_v39  ;;  %453 = vst [vmem:[#allocation4 + $0x18] sm:$0xff] %v445_v16 }
 0x1c7   : > { %454 = vst [vmem:[#allocation4 + $0x20] sm:$0xff] %v446_v40  ;;  %455 = vst [vmem:[#allocation4 + $0x28] sm:$0xff] %v447_v15 }
 0x1c8   : > { %456 = vst [vmem:[#allocation4 + $0x30] sm:$0xff] %v448_v41  ;;  %457 = vst [vmem:[#allocation4 + $0x38] sm:$0xff] %v449_v13 }
 0x1c9 PF: > { %p848_p8 = scmp.eq.s32.totalorder %s546_s15, 1  ;;  %s705_s24 = smov [#allocation4]  }
 0x1ca   : > { %s473_s25 = sshll.u32 %s705_s24, 4  ;;  %s474_s25 = int_to_ptr.vmem [resolvable:$true] %s473_s25 }
 0x1cb   : > { %s647_s26 = scalar_lea.vmem %s474_s25, 1024  ;;  %s653_s27 = scalar_lea.vmem %s474_s25, 2048 }
 0x1cc   : > { %p648_p9 = scmp.ne.s32.totalorder %s474_s25, %s647_s26  ;;  %p654_p12 = scmp.lt.s32.totalorder %s474_s25, %s474_s25 }
 0x1cd   : > { %p655_p13 = scmp.lt.s32.totalorder %s653_s27, %s647_s26 }
 0x1ce   : > { %p649_p10 = pnand %p648_p9, %p848_p8 }
 0x1cf   : > { %p656_p0 = por %p655_p13, %p654_p12 }
 0x1d0   : > { %p650_p11 = pneg %p649_p10 }
 0x1d2   : > { %p657_p1 = pnand %p656_p0, %p650_p11 }
 0x1d4   : > { %660 = shalt.err (!%p657_p1)
}
 0x1d5   : > { %s661_s29 = scalar_lea.hbm %s885_s3, 1024 }
 0x1d6   : > { %p662_p2 = scmp.ne.s32.totalorder %s885_s3, %s661_s29  ;;  %p667_p5 = scmp.lt.u32.totalorder %s661_s29, %s885_s3 }
 0x1d8   : > { %p663_p3 = pnand %p662_p2, %p848_p8 }
 0x1da   : > { %p664_p4 = pneg %p663_p3 }
 0x1dc   : > { %p669_p6 = pnand %p667_p5, %p664_p4 }
 0x1de   : > { %672 = shalt.err (!%p669_p6)
}
 0x1df   : > { %s706_s7 = smov 128   ;;  %s707_s8 = smov 8  }
 0x1e0   : > { %604 = dma.vmem_to_hbm [thread:$0]  (%p848_p8), %s474_s25, 1024, %s885_s3, [#allocation5], %s706_s7, %s706_s7, %s707_s8  }
 0x1e1 PF: > { %p612_p7 = scmp.ge.s32.totalorder %s699_s14, 2  ;;  %p613_p9 = scmp.eq.s32.totalorder %s547_s16, 1 }
 0x1e3   : > { %p608_p10 = pnand %p613_p9, %p612_p7 }
 0x1e5   : > { %686 = dma.done.wait (!%p608_p10), [#allocation5], 1024  }
 0x1e6   : > { %688 = vsyncadd (!%p608_p10), [#allocation5], 4294966272  ;;  %s16_s14 = sadd.s32 1, %s699_s14   ;;  %s887_s12 = smov %s695_s13 }
 0x1e7   : > { %p13_p11 = scmp.ge.s32.totalorder %s16_s14, 4   ;;  %s888_s13 = smov %s890_s17 }
 0x1e9   :  { %15 = sbr.rel (!%p13_p11) target bundleno = 3 (0x3), region = 83 }
 0x1f0   :  { %494 = vsyncpa [#allocation5], 1 }
 0x1f1   :  { %496 = vsyncpa [#allocation5 + $0x1], 1 }

</bundles_post_ra>
